<compile_context>
chip_gen: v6e
topology: v6e:2x2x1
jax: 0.10.0
libtpu: 0.0.40
codegen_flags: <defaults>
</compile_context>

<pallas_src>
import functools
import math

import jax
import jax.numpy as jnp
from jax.experimental import pallas as pl
from jax.experimental.pallas import tpu as pltpu


def _mha_kernel(xs_ref, mask_ref, w_ref, b_ref, wo_ref, bo_ref, o_ref,
                *, B, S, h, d_k):
    D = h * d_k
    hB = h * B

    # Replicate each (stream, batch) row block across its h heads (leading-dim
    # broadcast only) so the fused QKV projection is a single batched matmul:
    # flat batch index = (stream*B + b)*h + head.
    xs = xs_ref[...]                                             # (3*B, S, D)
    x_b = jnp.broadcast_to(
        xs.reshape(3 * B, 1, S, D), (3 * B, h, S, D)).reshape(3 * hB, S, D)

    qkv = jax.lax.dot_general(                                   # (3*B*h, S, d_k)
        x_b, w_ref[...],
        dimension_numbers=(((2,), (1,)), ((0,), (0,))),
        preferred_element_type=jnp.float32) + b_ref[...]

    q = qkv[0 * hB:1 * hB]                                       # (B*h, S, d_k)
    k = qkv[1 * hB:2 * hB]
    v = qkv[2 * hB:3 * hB]

    # Scores: contract d_k of Q and K directly (no explicit transpose),
    # batched over the fused (batch, head) axis.
    scale = jnp.float32(1.0 / math.sqrt(d_k))
    scores = jax.lax.dot_general(
        q, k, dimension_numbers=(((2,), (2,)), ((0,), (0,))),
        preferred_element_type=jnp.float32) * scale              # (B*h, S, S)

    # Padding mask (B,1,S) -> one masked_fill over the whole batched score
    # tensor (broadcast over heads and query rows).
    maskb = jnp.broadcast_to(
        mask_ref[...].reshape(B, 1, 1, S), (B, h, 1, S)).reshape(hB, 1, S)
    scores = jnp.where(maskb == 0, jnp.float32(-60000.0), scores)

    # Softmax over keys; one reciprocal per row instead of a full-tile divide.
    m = jnp.max(scores, axis=-1, keepdims=True)
    e = jnp.exp(scores - m)
    p = e * pl.reciprocal(jnp.sum(e, axis=-1, keepdims=True))
    # TODO(synk): dropout(p_attn) skipped — identity in eval mode.

    ctx = jax.lax.dot_general(                                   # (B*h, S, d_k)
        p, v, dimension_numbers=(((2,), (1,)), ((0,), (0,))),
        preferred_element_type=jnp.float32)

    # Output projection folded per head, then summed over heads — no lane
    # concatenate of the per-head contexts.
    y = jax.lax.dot_general(                                     # (B*h, S, D)
        ctx, wo_ref[...],
        dimension_numbers=(((2,), (1,)), ((0,), (0,))),
        preferred_element_type=jnp.float32)
    out = jnp.sum(y.reshape(B, h, S, D), axis=1) + bo_ref[...]   # (B, S, D)
    o_ref[...] = out.astype(o_ref.dtype)


def multi_headed_attention(query, key, value, mask, params, *, h):
    """query/key/value: (B, S, D); mask: (B, 1, S). Returns (B, S, D)."""
    B, S, D = query.shape
    assert D % h == 0
    d_k = D // h
    wq, bq, wk, bk, wv, bv, wo, bo = params

    # Stream-stacked inputs: row-block index = stream*B + b.
    xs = jnp.stack([query, key, value], axis=0).reshape(3 * B, S, D)

    # Head-major projection weights (one-time packing in plain XLA), replicated
    # per batch element so every in-kernel op is a leading-dim-only pattern.
    #   flat batch index = (stream*B + b)*h + head
    w_h = jnp.stack([wq, wk, wv], 0).reshape(3, D, h, d_k).transpose(0, 2, 1, 3)
    b_h = jnp.stack([bq, bk, bv], 0).reshape(3, 1, h, d_k).transpose(0, 2, 1, 3)
    w_rep = jnp.broadcast_to(w_h[:, None], (3, B, h, D, d_k)).reshape(3 * B * h, D, d_k)
    b_rep = jnp.broadcast_to(b_h[:, None], (3, B, h, 1, d_k)).reshape(3 * B * h, 1, d_k)

    # Output projection split per head (rows hd*d_k:(hd+1)*d_k of wo),
    # replicated per batch: flat index = b*h + head.
    wo_rep = jnp.broadcast_to(
        wo.reshape(1, h, d_k, D), (B, h, d_k, D)).reshape(B * h, d_k, D)

    kernel = functools.partial(_mha_kernel, B=B, S=S, h=h, d_k=d_k)
    vmem = pl.BlockSpec(memory_space=pltpu.MemorySpace.VMEM)  # whole-array blocks
    return pl.pallas_call(
        kernel,
        out_shape=jax.ShapeDtypeStruct((B, S, D), jnp.float32),
        in_specs=[vmem] * 6,
        out_specs=vmem,
    )(xs, mask, w_rep, b_rep, wo_rep, bo)


def _reference(query, key, value, mask, params, *, h):
    """Pure-JAX reference mirroring the PyTorch forward (eval mode)."""
    B, S, D = query.shape
    d_k = D // h
    wq, bq, wk, bk, wv, bv, wo, bo = params

    def proj(x, w, b):
        y = x @ w + b                                           # (B, S, D)
        return y.reshape(B, S, h, d_k).transpose(0, 2, 1, 3)    # (B, h, S, d_k)

    Q, K, V = proj(query, wq, bq), proj(key, wk, bk), proj(value, wv, bv)
    scores = jnp.einsum("bhqd,bhkd->bhqk", Q, K) / math.sqrt(d_k)
    m = mask[:, None, :, :]                                     # (B,1,1,S)
    scores = jnp.where(m == 0, -60000.0, scores)
    p = jax.nn.softmax(scores, axis=-1)
    x = jnp.einsum("bhqk,bhkd->bhqd", p, V)
    x = x.transpose(0, 2, 1, 3).reshape(B, S, D)
    return x @ wo + bo


if __name__ == "__main__":
    B, S, D, H = 2, 8, 32, 4

    key = jax.random.PRNGKey(0)
    keys = jax.random.split(key, 12)

    q = jax.random.normal(keys[0], (B, S, D), jnp.float32)
    k = jax.random.normal(keys[1], (B, S, D), jnp.float32)
    v = jax.random.normal(keys[2], (B, S, D), jnp.float32)
    # padding mask: last two key positions of batch 1 are masked out
    mask = jnp.ones((B, 1, S), jnp.float32).at[1, 0, -2:].set(0.0)

    def lin_init(kw, kb):
        bound = 1.0 / math.sqrt(D)
        w = jax.random.uniform(kw, (D, D), jnp.float32, -bound, bound)  # (in, out)
        b = jax.random.uniform(kb, (1, D), jnp.float32, -bound, bound)
        return w, b

    wq, bq = lin_init(keys[3], keys[4])
    wk, bk = lin_init(keys[5], keys[6])
    wv, bv = lin_init(keys[7], keys[8])
    wo, bo = lin_init(keys[9], keys[10])
    params = (wq, bq, wk, bk, wv, bv, wo, bo)

    out = multi_headed_attention(q, k, v, mask, params, h=H)
    out = jax.block_until_ready(out)

    ref = _reference(q, k, v, mask, params, h=H)
    assert out.shape == (B, S, D)
    assert jnp.allclose(out, ref, atol=1e-4, rtol=1e-4), "mismatch vs reference"

    print("KERNEL_OK")
</pallas_src>

<mosaic_0001>
module attributes {stable_mosaic.version = 11 : i64} {
  func.func @_mha_kernel(%arg0: memref<6x8x32xf32, #tpu.memory_space<vmem>>, %arg1: memref<2x1x8xf32, #tpu.memory_space<vmem>>, %arg2: memref<24x32x8xf32, #tpu.memory_space<vmem>>, %arg3: memref<24x1x8xf32, #tpu.memory_space<vmem>>, %arg4: memref<8x8x32xf32, #tpu.memory_space<vmem>>, %arg5: memref<1x32xf32, #tpu.memory_space<vmem>>, %arg6: memref<2x8x32xf32, #tpu.memory_space<vmem>>) attributes {dimension_semantics = [], scalar_prefetch = 0 : i64, scratch_operands = 0 : i64, tpu.core_type = #tpu.core_type<tc>} {
    %c0 = arith.constant 0 : index
    %c0_0 = arith.constant 0 : index
    %c0_1 = arith.constant 0 : index
    %0 = vector.load %arg0[%c0, %c0_0, %c0_1] : memref<6x8x32xf32, #tpu.memory_space<vmem>>, vector<6x8x32xf32>
    %1 = vector.shape_cast %0 : vector<6x8x32xf32> to vector<6x1x8x32xf32>
    %2 = vector.shape_cast %1 : vector<6x1x8x32xf32> to vector<6x1x8x32xf32>
    %3 = vector.broadcast %2 : vector<6x1x8x32xf32> to vector<6x4x8x32xf32>
    %4 = vector.shape_cast %3 : vector<6x4x8x32xf32> to vector<24x8x32xf32>
    %c0_2 = arith.constant 0 : index
    %c0_3 = arith.constant 0 : index
    %c0_4 = arith.constant 0 : index
    %5 = vector.load %arg2[%c0_2, %c0_3, %c0_4] : memref<24x32x8xf32, #tpu.memory_space<vmem>>, vector<24x32x8xf32>
    %cst = arith.constant dense<0.000000e+00> : vector<24x8x8xf32>
    %6 = tpu.matmul %4, %5, %cst {dimension_numbers = #tpu.dot_dimension_numbers<[2], [1], [1], [2], [0, 0, 0, 1, 1, 2], [0], [0]>} : vector<24x8x32xf32>, vector<24x32x8xf32>, vector<24x8x8xf32> -> vector<24x8x8xf32>
    %c0_5 = arith.constant 0 : index
    %c0_6 = arith.constant 0 : index
    %c0_7 = arith.constant 0 : index
    %7 = vector.load %arg3[%c0_5, %c0_6, %c0_7] : memref<24x1x8xf32, #tpu.memory_space<vmem>>, vector<24x1x8xf32>
    %8 = vector.broadcast %7 : vector<24x1x8xf32> to vector<24x8x8xf32>
    %9 = arith.addf %6, %8 : vector<24x8x8xf32>
    %10 = vector.extract_strided_slice %9 {offsets = [0, 0, 0], sizes = [8, 8, 8], strides = [1, 1, 1]} : vector<24x8x8xf32> to vector<8x8x8xf32>
    %11 = vector.extract_strided_slice %9 {offsets = [8, 0, 0], sizes = [8, 8, 8], strides = [1, 1, 1]} : vector<24x8x8xf32> to vector<8x8x8xf32>
    %12 = vector.extract_strided_slice %9 {offsets = [16, 0, 0], sizes = [8, 8, 8], strides = [1, 1, 1]} : vector<24x8x8xf32> to vector<8x8x8xf32>
    %cst_8 = arith.constant dense<0.000000e+00> : vector<8x8x8xf32>
    %13 = tpu.matmul %10, %11, %cst_8 {dimension_numbers = #tpu.dot_dimension_numbers<[2], [2], [1], [1], [0, 0, 0, 1, 1, 1], [0], [0]>} : vector<8x8x8xf32>, vector<8x8x8xf32>, vector<8x8x8xf32> -> vector<8x8x8xf32>
    %cst_9 = arith.constant 0.353553385 : f32
    %14 = vector.broadcast %cst_9 : f32 to vector<8x8x8xf32>
    %15 = arith.mulf %13, %14 : vector<8x8x8xf32>
    %c0_10 = arith.constant 0 : index
    %c0_11 = arith.constant 0 : index
    %c0_12 = arith.constant 0 : index
    %16 = vector.load %arg1[%c0_10, %c0_11, %c0_12] : memref<2x1x8xf32, #tpu.memory_space<vmem>>, vector<2x1x8xf32>
    %17 = vector.shape_cast %16 : vector<2x1x8xf32> to vector<2x1x1x8xf32>
    %18 = vector.shape_cast %17 : vector<2x1x1x8xf32> to vector<2x1x1x8xf32>
    %19 = vector.broadcast %18 : vector<2x1x1x8xf32> to vector<2x4x1x8xf32>
    %20 = vector.shape_cast %19 : vector<2x4x1x8xf32> to vector<8x1x8xf32>
    %cst_13 = arith.constant 0.000000e+00 : f32
    %21 = vector.broadcast %cst_13 : f32 to vector<8x1x8xf32>
    %22 = arith.cmpf oeq, %20, %21 : vector<8x1x8xf32>
    %cst_14 = arith.constant -6.000000e+04 : f32
    %23 = vector.shape_cast %22 : vector<8x1x8xi1> to vector<8x1x8xi1>
    %24 = vector.broadcast %23 : vector<8x1x8xi1> to vector<8x8x8xi1>
    %25 = vector.broadcast %cst_14 : f32 to vector<8x8x8xf32>
    %26 = arith.select %24, %25, %15 : vector<8x8x8xi1>, vector<8x8x8xf32>
    %cst_15 = arith.constant dense<0xFF800000> : vector<8x8xf32>
    %27 = vector.multi_reduction <maximumf>, %26, %cst_15 [2] : vector<8x8x8xf32> to vector<8x8xf32>
    %28 = vector.shape_cast %27 : vector<8x8xf32> to vector<8x8x1xf32>
    %29 = vector.broadcast %28 : vector<8x8x1xf32> to vector<8x8x8xf32>
    %30 = arith.subf %26, %29 : vector<8x8x8xf32>
    %31 = math.exp %30 : vector<8x8x8xf32>
    %cst_16 = arith.constant dense<0.000000e+00> : vector<8x8xf32>
    %32 = vector.multi_reduction <add>, %31, %cst_16 [2] : vector<8x8x8xf32> to vector<8x8xf32>
    %33 = vector.shape_cast %32 : vector<8x8xf32> to vector<8x8x1xf32>
    %34 = tpu.reciprocal %33 : vector<8x8x1xf32> -> vector<8x8x1xf32>
    %35 = vector.broadcast %34 : vector<8x8x1xf32> to vector<8x8x8xf32>
    %36 = arith.mulf %31, %35 : vector<8x8x8xf32>
    %cst_17 = arith.constant dense<0.000000e+00> : vector<8x8x8xf32>
    %37 = tpu.matmul %36, %12, %cst_17 {dimension_numbers = #tpu.dot_dimension_numbers<[2], [1], [1], [2], [0, 0, 0, 1, 1, 2], [0], [0]>} : vector<8x8x8xf32>, vector<8x8x8xf32>, vector<8x8x8xf32> -> vector<8x8x8xf32>
    %c0_18 = arith.constant 0 : index
    %c0_19 = arith.constant 0 : index
    %c0_20 = arith.constant 0 : index
    %38 = vector.load %arg4[%c0_18, %c0_19, %c0_20] : memref<8x8x32xf32, #tpu.memory_space<vmem>>, vector<8x8x32xf32>
    %cst_21 = arith.constant dense<0.000000e+00> : vector<8x8x32xf32>
    %39 = tpu.matmul %37, %38, %cst_21 {dimension_numbers = #tpu.dot_dimension_numbers<[2], [1], [1], [2], [0, 0, 0, 1, 1, 2], [0], [0]>} : vector<8x8x8xf32>, vector<8x8x32xf32>, vector<8x8x32xf32> -> vector<8x8x32xf32>
    %40 = vector.shape_cast %39 : vector<8x8x32xf32> to vector<2x4x8x32xf32>
    %cst_22 = arith.constant dense<0.000000e+00> : vector<2x8x32xf32>
    %41 = vector.multi_reduction <add>, %40, %cst_22 [1] : vector<2x4x8x32xf32> to vector<2x8x32xf32>
    %c0_23 = arith.constant 0 : index
    %c0_24 = arith.constant 0 : index
    %42 = vector.load %arg5[%c0_23, %c0_24] : memref<1x32xf32, #tpu.memory_space<vmem>>, vector<1x32xf32>
    %43 = vector.shape_cast %42 : vector<1x32xf32> to vector<1x1x32xf32>
    %44 = vector.broadcast %43 : vector<1x1x32xf32> to vector<2x8x32xf32>
    %45 = arith.addf %41, %44 : vector<2x8x32xf32>
    %c0_25 = arith.constant 0 : index
    %c0_26 = arith.constant 0 : index
    %c0_27 = arith.constant 0 : index
    %46 = vector.load %arg6[%c0_25, %c0_26, %c0_27] : memref<2x8x32xf32, #tpu.memory_space<vmem>>, vector<2x8x32xf32>
    tpu.vector_store %arg6[%c0_25, %c0_26, %c0_27], %45 {strides = array<i32>} : memref<2x8x32xf32, #tpu.memory_space<vmem>>, vector<2x8x32xf32>,
    return
  }
}

</mosaic_0001>

<bundles_post_ra>
// kernel: tpu_custom_call.1
= control target key start
LH: loop header
LB: loop body
LE: loop exit
PB: predicated region body
PF: predicated region fallthrough
CT: control target
= control target key end

     0   :  { %v4632_v2 = vmov 0.0   ;;  %vm294_vm0 = vcmask 261120   ;;  %vm4633_vm1 = vmmov 0   ;;  %s5433_s0 = inlined_call_operand.vmem [shape: f32[6,8,32], index: 0, kind: input, shape index: {}]   ;;  %s5434_s1 = inlined_call_operand.vmem [shape: f32[2,1,8], index: 1, kind: input, shape index: {}]   ;;  %s5435_s2 = inlined_call_operand.vmem [shape: f32[24,32,8], index: 2, kind: input, shape index: {}]   ;;  %s5436_s3 = inlined_call_operand.vmem [shape: f32[24,1,8], index: 3, kind: input, shape index: {}]   ;;  %s5437_s4 = inlined_call_operand.vmem [shape: f32[8,8,32], index: 4, kind: input, shape index: {}]   ;;  %s5438_s5 = inlined_call_operand.vmem [shape: f32[1,32], index: 5, kind: input, shape index: {}]   ;;  %s5439_s6 = inlined_call_operand.hbm [shape: f32[2,8,32], index: 6, kind: output, shape index: {}]  }
   0x1   :  { %v33_v0 = vld [vmem:[%s5435_s2 + $0x18] sm:$0xff]  ;;  %4188 = vmatprep.subr.mxu0 %v4632_v2  ;;  %4199 = vmatprep.subr.mxu1 %v4632_v2  ;;  %v32_v3 = vld [vmem:[%s5435_s2 + $0x10] sm:$0xff]  ;;  %v31_v5 = vld [vmem:[%s5435_s2 + $0x8] sm:$0xff] }
   0x2   :  { %v37_v1 = vld [vmem:[%s5435_s2 + $0x38] sm:$0xff]  ;;  %v36_v4 = vld [vmem:[%s5435_s2 + $0x30] sm:$0xff]  ;;  %4189 = vmatpush3.msra.mxu0 %v33_v0  ;;  %v35_v6 = vld [vmem:[%s5435_s2 + $0x28] sm:$0xff]  ;;  %4196 = vmatprep.mubr.msk.f32.mxu0 %vm4633_vm1, %v4632_v2 }
   0x3   :  { %4200 = vmatpush3.msra.mxu1 %v37_v1  ;;  %4190 = vmatprep.subr.mxu0 %v4632_v2  ;;  %v30_v7 = vld [vmem:[%s5435_s2] sm:$0xff]  ;;  %v41_v10 = vld [vmem:[%s5435_s2 + $0x58] sm:$0xff]  ;;  %v40_v12 = vld [vmem:[%s5435_s2 + $0x50] sm:$0xff] }
   0x4   :  { %4201 = vmatprep.subr.mxu1 %v4632_v2  ;;  %4191 = vmatpush3.msra.mxu0 %v32_v3  ;;  %v34_v8 = vld [vmem:[%s5435_s2 + $0x20] sm:$0xff]  ;;  %v45_v11 = vld [vmem:[%s5435_s2 + $0x78] sm:$0xff]  ;;  %v44_v13 = vld [vmem:[%s5435_s2 + $0x70] sm:$0xff] }
   0x5   :  { %4202 = vmatpush3.msra.mxu1 %v36_v4  ;;  %4192 = vmatprep.subr.mxu0 %v4632_v2  ;;  %v24_v9 = vld [vmem:[%s5433_s0] sm:$0xff]  ;;  %v39_v14 = vld [vmem:[%s5435_s2 + $0x48] sm:$0xff]  ;;  %v49_v18 = vld [vmem:[%s5435_s2 + $0x98] sm:$0xff] }
   0x6   :  { %4203 = vmatprep.subr.mxu1 %v4632_v2  ;;  %4193 = vmatpush3.msra.mxu0 %v31_v5  ;;  %v43_v15 = vld [vmem:[%s5435_s2 + $0x68] sm:$0xff]  ;;  %v38_v16 = vld [vmem:[%s5435_s2 + $0x40] sm:$0xff]  ;;  %v53_v19 = vld [vmem:[%s5435_s2 + $0xb8] sm:$0xff] }
   0x7   :  { %4204 = vmatpush3.msra.mxu1 %v35_v6  ;;  %4194 = vmatprep.subr.mxu0 %v4632_v2  ;;  %v42_v17 = vld [vmem:[%s5435_s2 + $0x60] sm:$0xff]  ;;  %v48_v20 = vld [vmem:[%s5435_s2 + $0x90] sm:$0xff]  ;;  %v47_v22 = vld [vmem:[%s5435_s2 + $0x88] sm:$0xff] }
   0x8   :  { %4205 = vmatprep.subr.mxu1 %v4632_v2  ;;  %4195 = vmatpush3.msra.mxu0 %v30_v7  ;;  %v52_v21 = vld [vmem:[%s5435_s2 + $0xb0] sm:$0xff]  ;;  %v51_v23 = vld [vmem:[%s5435_s2 + $0xa8] sm:$0xff] }
   0x9   :  { %4206 = vmatpush3.msra.mxu1 %v34_v8  ;;  %4197 = vmatmul.mubr.msk.f32.vlgmr.msra.gmra.mxu0 %vm294_vm0, %v24_v9 }
   0xa   :  { %4207 = vmatprep.mubr.msk.f32.mxu1 %vm4633_vm1, %v4632_v2  ;;  %4210 = vmatprep.subr.mxu0 %v4632_v2 }
   0xb   :  { %4221 = vmatprep.subr.mxu1 %v4632_v2  ;;  %4208 = vmatmul.mubr.msk.f32.vlgmr.msra.gmra.mxu1 %vm294_vm0, %v24_v9 }
   0xc   :  { %4211 = vmatpush3.msra.mxu0 %v41_v10  ;;  %4222 = vmatpush3.msra.mxu1 %v45_v11 }
   0xd   :  { %4212 = vmatprep.subr.mxu0 %v4632_v2  ;;  %4223 = vmatprep.subr.mxu1 %v4632_v2 }
   0xe   :  { %4213 = vmatpush3.msra.mxu0 %v40_v12  ;;  %4224 = vmatpush3.msra.mxu1 %v44_v13 }
   0xf   :  { %4214 = vmatprep.subr.mxu0 %v4632_v2  ;;  %4225 = vmatprep.subr.mxu1 %v4632_v2 }
  0x10   :  { %4215 = vmatpush3.msra.mxu0 %v39_v14  ;;  %4226 = vmatpush3.msra.mxu1 %v43_v15 }
  0x11   :  { %4216 = vmatprep.subr.mxu0 %v4632_v2  ;;  %4227 = vmatprep.subr.mxu1 %v4632_v2 }
  0x12   :  { %4217 = vmatpush3.msra.mxu0 %v38_v16  ;;  %4218 = vmatprep.mubr.msk.f32.mxu0 %vm4633_vm1, %v4632_v2 }
  0x13   :  { %4228 = vmatpush3.msra.mxu1 %v42_v17  ;;  %4219 = vmatmul.mubr.msk.f32.vlgmr.msra.gmra.mxu0 %vm294_vm0, %v24_v9 }
  0x14   :  { %4229 = vmatprep.mubr.msk.f32.mxu1 %vm4633_vm1, %v4632_v2  ;;  %4232 = vmatprep.subr.mxu0 %v4632_v2 }
  0x15   :  { %4243 = vmatprep.subr.mxu1 %v4632_v2  ;;  %4230 = vmatmul.mubr.msk.f32.vlgmr.msra.gmra.mxu1 %vm294_vm0, %v24_v9 }
  0x16   :  { %4233 = vmatpush3.msra.mxu0 %v49_v18  ;;  %4244 = vmatpush3.msra.mxu1 %v53_v19 }
  0x17   :  { %4234 = vmatprep.subr.mxu0 %v4632_v2  ;;  %4245 = vmatprep.subr.mxu1 %v4632_v2 }
  0x18   :  { %11 = vsyncpa [#allocation3], 0  ;;  %4235 = vmatpush3.msra.mxu0 %v48_v20  ;;  %4246 = vmatpush3.msra.mxu1 %v52_v21  ;;  %v46_v24 = vld [vmem:[%s5435_s2 + $0x80] sm:$0xff]  ;;  %v25_v26 = vld [vmem:[%s5433_s0 + $0x8] sm:$0xff]  ;;  %vm1993_vm2 = vcmask 64512  }
  0x19   :  { %4236 = vmatprep.subr.mxu0 %v4632_v2  ;;  %4247 = vmatprep.subr.mxu1 %v4632_v2  ;;  %v50_v25 = vld [vmem:[%s5435_s2 + $0xa0] sm:$0xff]  ;;  %v57_v27 = vld [vmem:[%s5435_s2 + $0xd8] sm:$0xff]  ;;  %v56_v29 = vld [vmem:[%s5435_s2 + $0xd0] sm:$0xff] }
  0x1a   :  { %4237 = vmatpush3.msra.mxu0 %v47_v22  ;;  %4248 = vmatpush3.msra.mxu1 %v51_v23  ;;  %v61_v28 = vld [vmem:[%s5435_s2 + $0xf8] sm:$0xff]  ;;  %v60_v30 = vld [vmem:[%s5435_s2 + $0xf0] sm:$0xff]  ;;  %v55_v31 = vld [vmem:[%s5435_s2 + $0xc8] sm:$0xff] }
  0x1b   :  { %4238 = vmatprep.subr.mxu0 %v4632_v2  ;;  %4249 = vmatprep.subr.mxu1 %v4632_v2  ;;  %v59_v32 = vld [vmem:[%s5435_s2 + $0xe8] sm:$0xff]  ;;  %v54_v33 = vld [vmem:[%s5435_s2 + $0xc0] sm:$0xff]  ;;  %v65_v35 = vld [vmem:[%s5435_s2 + $0x118] sm:$0xff] }
  0x1c   :  { %4239 = vmatpush3.msra.mxu0 %v46_v24  ;;  %4240 = vmatprep.mubr.msk.f32.mxu0 %vm4633_vm1, %v4632_v2  ;;  %v58_v34 = vld [vmem:[%s5435_s2 + $0xe0] sm:$0xff]  ;;  %v69_v36 = vld [vmem:[%s5435_s2 + $0x138] sm:$0xff]  ;;  %v64_v37 = vld [vmem:[%s5435_s2 + $0x110] sm:$0xff] }
  0x1d   :  { %4250 = vmatpush3.msra.mxu1 %v50_v25  ;;  %4241 = vmatmul.mubr.msk.f32.vlgmr.msra.gmra.mxu0 %vm294_vm0, %v25_v26  ;;  %v68_v38 = vld [vmem:[%s5435_s2 + $0x130] sm:$0xff]  ;;  %v63_v39 = vld [vmem:[%s5435_s2 + $0x108] sm:$0xff]  ;;  %v62_v41 = vld [vmem:[%s5435_s2 + $0x100] sm:$0xff] }
  0x1e   :  { %4251 = vmatprep.mubr.msk.f32.mxu1 %vm4633_vm1, %v4632_v2  ;;  %4254 = vmatprep.subr.mxu0 %v4632_v2  ;;  %v67_v40 = vld [vmem:[%s5435_s2 + $0x128] sm:$0xff]  ;;  %v66_v42 = vld [vmem:[%s5435_s2 + $0x120] sm:$0xff]  ;;  %v26_v43 = vld [vmem:[%s5433_s0 + $0x10] sm:$0xff] }
  0x1f   :  { %4265 = vmatprep.subr.mxu1 %v4632_v2  ;;  %4252 = vmatmul.mubr.msk.f32.vlgmr.msra.gmra.mxu1 %vm294_vm0, %v25_v26  ;;  %v73_v44 = vld [vmem:[%s5435_s2 + $0x158] sm:$0xff]  ;;  %v72_v46 = vld [vmem:[%s5435_s2 + $0x150] sm:$0xff]  ;;  %v71_v48 = vld [vmem:[%s5435_s2 + $0x148] sm:$0xff] }
  0x20   :  { %4255 = vmatpush3.msra.mxu0 %v57_v27  ;;  %4266 = vmatpush3.msra.mxu1 %v61_v28  ;;  %v77_v45 = vld [vmem:[%s5435_s2 + $0x178] sm:$0xff]  ;;  %v76_v47 = vld [vmem:[%s5435_s2 + $0x170] sm:$0xff]  ;;  %v75_v49 = vld [vmem:[%s5435_s2 + $0x168] sm:$0xff] }
  0x21   :  { %4256 = vmatprep.subr.mxu0 %v4632_v2  ;;  %4267 = vmatprep.subr.mxu1 %v4632_v2  ;;  %v70_v50 = vld [vmem:[%s5435_s2 + $0x140] sm:$0xff]  ;;  %v81_v52 = vld [vmem:[%s5435_s2 + $0x198] sm:$0xff]  ;;  %v80_v54 = vld [vmem:[%s5435_s2 + $0x190] sm:$0xff] }
  0x22   :  { %4257 = vmatpush3.msra.mxu0 %v56_v29  ;;  %4268 = vmatpush3.msra.mxu1 %v60_v30  ;;  %v74_v51 = vld [vmem:[%s5435_s2 + $0x160] sm:$0xff]  ;;  %v85_v53 = vld [vmem:[%s5435_s2 + $0x1b8] sm:$0xff]  ;;  %v84_v55 = vld [vmem:[%s5435_s2 + $0x1b0] sm:$0xff] }
  0x23   :  { %4258 = vmatprep.subr.mxu0 %v4632_v2  ;;  %4269 = vmatprep.subr.mxu1 %v4632_v2  ;;  %v79_v56 = vld [vmem:[%s5435_s2 + $0x188] sm:$0xff]  ;;  %v78_v58 = vld [vmem:[%s5435_s2 + $0x180] sm:$0xff]  ;;  %v27_v60 = vld [vmem:[%s5433_s0 + $0x18] sm:$0xff] }
  0x24   :  { %4259 = vmatpush3.msra.mxu0 %v55_v31  ;;  %4270 = vmatpush3.msra.mxu1 %v59_v32  ;;  %v83_v57 = vld [vmem:[%s5435_s2 + $0x1a8] sm:$0xff]  ;;  %v82_v59 = vld [vmem:[%s5435_s2 + $0x1a0] sm:$0xff]  ;;  %v89_v61 = vld [vmem:[%s5435_s2 + $0x1d8] sm:$0xff] }
  0x25   :  { %4260 = vmatprep.subr.mxu0 %v4632_v2  ;;  %4271 = vmatprep.subr.mxu1 %v4632_v2  ;;  %v93_v62 = vld [vmem:[%s5435_s2 + $0x1f8] sm:$0xff]  ;;  %v88_v63 = vld [vmem:[%s5435_s2 + $0x1d0] sm:$0xff]  ;;  %v87_v1 = vld [vmem:[%s5435_s2 + $0x1c8] sm:$0xff] }
  0x26   :  { %4261 = vmatpush3.msra.mxu0 %v54_v33  ;;  %4262 = vmatprep.mubr.msk.f32.mxu0 %vm4633_vm1, %v4632_v2  ;;  %v92_v0 = vld [vmem:[%s5435_s2 + $0x1f0] sm:$0xff]  ;;  %v91_v3 = vld [vmem:[%s5435_s2 + $0x1e8] sm:$0xff]  ;;  %v86_v4 = vld [vmem:[%s5435_s2 + $0x1c0] sm:$0xff] }
  0x27   :  { %4272 = vmatpush3.msra.mxu1 %v58_v34  ;;  %4263 = vmatmul.mubr.msk.f32.vlgmr.msra.gmra.mxu0 %vm294_vm0, %v25_v26  ;;  %v90_v5 = vld [vmem:[%s5435_s2 + $0x1e0] sm:$0xff]  ;;  %v97_v6 = vld [vmem:[%s5435_s2 + $0x218] sm:$0xff]  ;;  %v96_v8 = vld [vmem:[%s5435_s2 + $0x210] sm:$0xff] }
  0x28   :  { %4273 = vmatprep.mubr.msk.f32.mxu1 %vm4633_vm1, %v4632_v2  ;;  %4276 = vmatprep.subr.mxu0 %v4632_v2  ;;  %v101_v7 = vld [vmem:[%s5435_s2 + $0x238] sm:$0xff]  ;;  %v100_v9 = vld [vmem:[%s5435_s2 + $0x230] sm:$0xff]  ;;  %v95_v10 = vld [vmem:[%s5435_s2 + $0x208] sm:$0xff] }
  0x29   :  { %4287 = vmatprep.subr.mxu1 %v4632_v2  ;;  %4274 = vmatmul.mubr.msk.f32.vlgmr.msra.gmra.mxu1 %vm294_vm0, %v25_v26  ;;  %v99_v11 = vld [vmem:[%s5435_s2 + $0x228] sm:$0xff]  ;;  %v94_v12 = vld [vmem:[%s5435_s2 + $0x200] sm:$0xff]  ;;  %v105_v15 = vld [vmem:[%s5435_s2 + $0x258] sm:$0xff] }
  0x2a   :  { %4277 = vmatpush3.msra.mxu0 %v65_v35  ;;  %4288 = vmatpush3.msra.mxu1 %v69_v36  ;;  %v98_v13 = vld [vmem:[%s5435_s2 + $0x220] sm:$0xff]  ;;  %v109_v16 = vld [vmem:[%s5435_s2 + $0x278] sm:$0xff]  ;;  %v104_v17 = vld [vmem:[%s5435_s2 + $0x250] sm:$0xff] }
  0x2b   :  { %4278 = vmatprep.subr.mxu0 %v4632_v2  ;;  %4289 = vmatprep.subr.mxu1 %v4632_v2  ;;  %v28_v14 = vld [vmem:[%s5433_s0 + $0x20] sm:$0xff]  ;;  %v108_v18 = vld [vmem:[%s5435_s2 + $0x270] sm:$0xff]  ;;  %v103_v19 = vld [vmem:[%s5435_s2 + $0x248] sm:$0xff] }
  0x2c   :  { %4279 = vmatpush3.msra.mxu0 %v64_v37  ;;  %4290 = vmatpush3.msra.mxu1 %v68_v38  ;;  %v107_v20 = vld [vmem:[%s5435_s2 + $0x268] sm:$0xff]  ;;  %v102_v21 = vld [vmem:[%s5435_s2 + $0x240] sm:$0xff]  ;;  %v113_v23 = vld [vmem:[%s5435_s2 + $0x298] sm:$0xff] }
  0x2d   :  { %4280 = vmatprep.subr.mxu0 %v4632_v2  ;;  %4291 = vmatprep.subr.mxu1 %v4632_v2  ;;  %v106_v22 = vld [vmem:[%s5435_s2 + $0x260] sm:$0xff]  ;;  %v117_v24 = vld [vmem:[%s5435_s2 + $0x2b8] sm:$0xff]  ;;  %v112_v25 = vld [vmem:[%s5435_s2 + $0x290] sm:$0xff] }
  0x2e   :  { %4281 = vmatpush3.msra.mxu0 %v63_v39  ;;  %4292 = vmatpush3.msra.mxu1 %v67_v40  ;;  %v116_v26 = vld [vmem:[%s5435_s2 + $0x2b0] sm:$0xff]  ;;  %v111_v27 = vld [vmem:[%s5435_s2 + $0x288] sm:$0xff]  ;;  %v110_v29 = vld [vmem:[%s5435_s2 + $0x280] sm:$0xff] }
  0x2f   :  { %4282 = vmatprep.subr.mxu0 %v4632_v2  ;;  %4293 = vmatprep.subr.mxu1 %v4632_v2  ;;  %v115_v28 = vld [vmem:[%s5435_s2 + $0x2a8] sm:$0xff]  ;;  %v114_v30 = vld [vmem:[%s5435_s2 + $0x2a0] sm:$0xff]  ;;  %v121_v32 = vld [vmem:[%s5435_s2 + $0x2d8] sm:$0xff] }
  0x30   :  { %4283 = vmatpush3.msra.mxu0 %v62_v41  ;;  %4284 = vmatprep.mubr.msk.f32.mxu0 %vm4633_vm1, %v4632_v2  ;;  %v29_v31 = vld [vmem:[%s5433_s0 + $0x28] sm:$0xff]  ;;  %v125_v33 = vld [vmem:[%s5435_s2 + $0x2f8] sm:$0xff]  ;;  %v120_v34 = vld [vmem:[%s5435_s2 + $0x2d0] sm:$0xff] }
  0x31   :  { %4294 = vmatpush3.msra.mxu1 %v66_v42  ;;  %4295 = vmatprep.mubr.msk.f32.mxu1 %vm4633_vm1, %v4632_v2  ;;  %v124_v35 = vld [vmem:[%s5435_s2 + $0x2f0] sm:$0xff]  ;;  %v119_v36 = vld [vmem:[%s5435_s2 + $0x2c8] sm:$0xff]  ;;  %v118_v38 = vld [vmem:[%s5435_s2 + $0x2c0] sm:$0xff] }
  0x32   :  { %4285 = vmatmul.mubr.msk.f32.vlgmr.msra.gmra.mxu0 %vm294_vm0, %v26_v43  ;;  %4296 = vmatmul.mubr.msk.f32.vlgmr.msra.gmra.mxu1 %vm294_vm0, %v26_v43  ;;  %v123_v37 = vld [vmem:[%s5435_s2 + $0x2e8] sm:$0xff]  ;;  %v122_v39 = vld [vmem:[%s5435_s2 + $0x2e0] sm:$0xff] }
  0x33   :  { %4298 = vmatprep.subr.mxu0 %v4632_v2  ;;  %4309 = vmatprep.subr.mxu1 %v4632_v2 }
  0x34   :  { %4299 = vmatpush3.msra.mxu0 %v73_v44  ;;  %4310 = vmatpush3.msra.mxu1 %v77_v45 }
  0x35   :  { %4300 = vmatprep.subr.mxu0 %v4632_v2  ;;  %4311 = vmatprep.subr.mxu1 %v4632_v2 }
  0x36   :  { %4301 = vmatpush3.msra.mxu0 %v72_v46  ;;  %4312 = vmatpush3.msra.mxu1 %v76_v47 }
  0x37   :  { %4302 = vmatprep.subr.mxu0 %v4632_v2  ;;  %4313 = vmatprep.subr.mxu1 %v4632_v2 }
  0x38   :  { %4303 = vmatpush3.msra.mxu0 %v71_v48  ;;  %4314 = vmatpush3.msra.mxu1 %v75_v49 }
  0x39   :  { %4304 = vmatprep.subr.mxu0 %v4632_v2  ;;  %4315 = vmatprep.subr.mxu1 %v4632_v2 }
  0x3a   :  { %4305 = vmatpush3.msra.mxu0 %v70_v50  ;;  %4306 = vmatprep.mubr.msk.f32.mxu0 %vm4633_vm1, %v4632_v2 }
  0x3b   :  { %4316 = vmatpush3.msra.mxu1 %v74_v51  ;;  %4317 = vmatprep.mubr.msk.f32.mxu1 %vm4633_vm1, %v4632_v2 }
  0x3c   :  { %4307 = vmatmul.mubr.msk.f32.vlgmr.msra.gmra.mxu0 %vm294_vm0, %v26_v43  ;;  %4318 = vmatmul.mubr.msk.f32.vlgmr.msra.gmra.mxu1 %vm294_vm0, %v26_v43 }
  0x3d   :  { %4320 = vmatprep.subr.mxu0 %v4632_v2  ;;  %4331 = vmatprep.subr.mxu1 %v4632_v2 }
  0x3e   :  { %4321 = vmatpush3.msra.mxu0 %v81_v52  ;;  %4332 = vmatpush3.msra.mxu1 %v85_v53 }
  0x3f   :  { %4322 = vmatprep.subr.mxu0 %v4632_v2  ;;  %4333 = vmatprep.subr.mxu1 %v4632_v2 }
  0x40   :  { %4323 = vmatpush3.msra.mxu0 %v80_v54  ;;  %4334 = vmatpush3.msra.mxu1 %v84_v55 }
  0x41   :  { %4324 = vmatprep.subr.mxu0 %v4632_v2  ;;  %4335 = vmatprep.subr.mxu1 %v4632_v2 }
  0x42   :  { %4325 = vmatpush3.msra.mxu0 %v79_v56  ;;  %4336 = vmatpush3.msra.mxu1 %v83_v57  ;;  %v3947_v56 = vld [vmem:[%s5436_s3 + $0x8] ss:$0 sm:$0xff]  ;;  %v3948_v57 = vld [vmem:[%s5436_s3 + $0x9] ss:$0 sm:$0xff] }
  0x43   :  { %4326 = vmatprep.subr.mxu0 %v4632_v2  ;;  %4337 = vmatprep.subr.mxu1 %v4632_v2 }
  0x44   :  { %4327 = vmatpush3.msra.mxu0 %v78_v58  ;;  %4328 = vmatprep.mubr.msk.f32.mxu0 %vm4633_vm1, %v4632_v2 }
  0x45   :  { %4338 = vmatpush3.msra.mxu1 %v82_v59  ;;  %4339 = vmatprep.mubr.msk.f32.mxu1 %vm4633_vm1, %v4632_v2 }
  0x46   :  { %4329 = vmatmul.mubr.msk.f32.vlgmr.msra.gmra.mxu0 %vm294_vm0, %v27_v60  ;;  %4340 = vmatmul.mubr.msk.f32.vlgmr.msra.gmra.mxu1 %vm294_vm0, %v27_v60 }
  0x47   :  { %4342 = vmatprep.subr.mxu0 %v4632_v2  ;;  %4353 = vmatprep.subr.mxu1 %v4632_v2 }
  0x48   :  { %4343 = vmatpush3.msra.mxu0 %v89_v61  ;;  %4354 = vmatpush3.msra.mxu1 %v93_v62  ;;  %v3940_v61 = vld [vmem:[%s5436_s3 + $0x1] ss:$0 sm:$0xff] }
  0x49   :  { %4344 = vmatprep.subr.mxu0 %v4632_v2  ;;  %4355 = vmatprep.subr.mxu1 %v4632_v2 }
  0x4a   :  { %4345 = vmatpush3.msra.mxu0 %v88_v63  ;;  %4356 = vmatpush3.msra.mxu1 %v92_v0 }
  0x4b   :  { %4346 = vmatprep.subr.mxu0 %v4632_v2  ;;  %4357 = vmatprep.subr.mxu1 %v4632_v2 }
  0x4c   :  { %4347 = vmatpush3.msra.mxu0 %v87_v1  ;;  %4358 = vmatpush3.msra.mxu1 %v91_v3 }
  0x4d   :  { %4348 = vmatprep.subr.mxu0 %v4632_v2  ;;  %4359 = vmatprep.subr.mxu1 %v4632_v2 }
  0x4e   :  { %4349 = vmatpush3.msra.mxu0 %v86_v4  ;;  %4350 = vmatprep.mubr.msk.f32.mxu0 %vm4633_vm1, %v4632_v2 }
  0x4f   :  { %4360 = vmatpush3.msra.mxu1 %v90_v5  ;;  %4361 = vmatprep.mubr.msk.f32.mxu1 %vm4633_vm1, %v4632_v2  ;;  %v3949_v5 = vld [vmem:[%s5436_s3 + $0xa] ss:$0 sm:$0xff] }
  0x50   :  { %4351 = vmatmul.mubr.msk.f32.vlgmr.msra.gmra.mxu0 %vm294_vm0, %v27_v60  ;;  %4362 = vmatmul.mubr.msk.f32.vlgmr.msra.gmra.mxu1 %vm294_vm0, %v27_v60  ;;  %v3939_v60 = vld [vmem:[%s5436_s3] ss:$0 sm:$0xff] }
  0x51   :  { %4364 = vmatprep.subr.mxu0 %v4632_v2  ;;  %4375 = vmatprep.subr.mxu1 %v4632_v2 }
  0x52   :  { %4365 = vmatpush3.msra.mxu0 %v97_v6  ;;  %4376 = vmatpush3.msra.mxu1 %v101_v7  ;;  %v3950_v6 = vld [vmem:[%s5436_s3 + $0xb] ss:$0 sm:$0xff] }
  0x53   :  { %4366 = vmatprep.subr.mxu0 %v4632_v2  ;;  %4377 = vmatprep.subr.mxu1 %v4632_v2 }
  0x54   :  { %4367 = vmatpush3.msra.mxu0 %v96_v8  ;;  %4378 = vmatpush3.msra.mxu1 %v100_v9  ;;  %v3941_v9 = vld [vmem:[%s5436_s3 + $0x2] ss:$0 sm:$0xff] }
  0x55   :  { %4368 = vmatprep.subr.mxu0 %v4632_v2  ;;  %4379 = vmatprep.subr.mxu1 %v4632_v2 }
  0x56   :  { %4369 = vmatpush3.msra.mxu0 %v95_v10  ;;  %4380 = vmatpush3.msra.mxu1 %v99_v11  ;;  %v3942_v10 = vld [vmem:[%s5436_s3 + $0x3] ss:$0 sm:$0xff] }
  0x57   :  { %4370 = vmatprep.subr.mxu0 %v4632_v2  ;;  %4381 = vmatprep.subr.mxu1 %v4632_v2 }
  0x58   :  { %4371 = vmatpush3.msra.mxu0 %v94_v12  ;;  %4382 = vmatpush3.msra.mxu1 %v98_v13 }
  0x59   :  { %4372 = vmatprep.mubr.msk.f32.mxu0 %vm4633_vm1, %v4632_v2  ;;  %4383 = vmatprep.mubr.msk.f32.mxu1 %vm4633_vm1, %v4632_v2 }
  0x5a   :  { %4386 = vmatprep.subr.mxu0 %v4632_v2  ;;  %4397 = vmatprep.subr.mxu1 %v4632_v2 }
  0x5b   :  { %4373 = vmatmul.mubr.msk.f32.vlgmr.msra.gmra.mxu0 %vm294_vm0, %v28_v14  ;;  %4384 = vmatmul.mubr.msk.f32.vlgmr.msra.gmra.mxu1 %vm294_vm0, %v28_v14 }
  0x5c   :  { %4387 = vmatpush3.msra.mxu0 %v105_v15  ;;  %4398 = vmatpush3.msra.mxu1 %v109_v16 }
  0x5d   :  { %4388 = vmatprep.subr.mxu0 %v4632_v2  ;;  %4399 = vmatprep.subr.mxu1 %v4632_v2 }
  0x5e   :  { %4389 = vmatpush3.msra.mxu0 %v104_v17  ;;  %4400 = vmatpush3.msra.mxu1 %v108_v18  ;;  %v3951_v17 = vld [vmem:[%s5436_s3 + $0xc] ss:$0 sm:$0xff]  ;;  %v3952_v18 = vld [vmem:[%s5436_s3 + $0xd] ss:$0 sm:$0xff] }
  0x5f   :  { %4390 = vmatprep.subr.mxu0 %v4632_v2  ;;  %4401 = vmatprep.subr.mxu1 %v4632_v2 }
  0x60   :  { %4391 = vmatpush3.msra.mxu0 %v103_v19  ;;  %4402 = vmatpush3.msra.mxu1 %v107_v20 }
  0x61   :  { %4392 = vmatprep.subr.mxu0 %v4632_v2  ;;  %4403 = vmatprep.subr.mxu1 %v4632_v2 }
  0x62   :  { %4393 = vmatpush3.msra.mxu0 %v102_v21  ;;  %4404 = vmatpush3.msra.mxu1 %v106_v22  ;;  %v3943_v21 = vld [vmem:[%s5436_s3 + $0x4] ss:$0 sm:$0xff]  ;;  %v3944_v22 = vld [vmem:[%s5436_s3 + $0x5] ss:$0 sm:$0xff] }
  0x63   :  { %4394 = vmatprep.mubr.msk.f32.mxu0 %vm4633_vm1, %v4632_v2  ;;  %4405 = vmatprep.mubr.msk.f32.mxu1 %vm4633_vm1, %v4632_v2 }
  0x64   :  { %4408 = vmatprep.subr.mxu0 %v4632_v2  ;;  %4419 = vmatprep.subr.mxu1 %v4632_v2 }
  0x65   :  { %4395 = vmatmul.mubr.msk.f32.vlgmr.msra.gmra.mxu0 %vm294_vm0, %v28_v14  ;;  %4406 = vmatmul.mubr.msk.f32.vlgmr.msra.gmra.mxu1 %vm294_vm0, %v28_v14 }
  0x66   :  { %4409 = vmatpush3.msra.mxu0 %v113_v23  ;;  %4420 = vmatpush3.msra.mxu1 %v117_v24 }
  0x67   :  { %4410 = vmatprep.subr.mxu0 %v4632_v2  ;;  %4421 = vmatprep.subr.mxu1 %v4632_v2 }
  0x68   :  { %4411 = vmatpush3.msra.mxu0 %v112_v25  ;;  %4422 = vmatpush3.msra.mxu1 %v116_v26 }
  0x69   :  { %4412 = vmatprep.subr.mxu0 %v4632_v2  ;;  %4423 = vmatprep.subr.mxu1 %v4632_v2 }
  0x6a   :  { %4413 = vmatpush3.msra.mxu0 %v111_v27  ;;  %4424 = vmatpush3.msra.mxu1 %v115_v28 }
  0x6b   :  { %4414 = vmatprep.subr.mxu0 %v4632_v2  ;;  %4425 = vmatprep.subr.mxu1 %v4632_v2 }
  0x6c   :  { %4415 = vmatpush3.msra.mxu0 %v110_v29  ;;  %4426 = vmatpush3.msra.mxu1 %v114_v30  ;;  %v3953_v29 = vld [vmem:[%s5436_s3 + $0xe] ss:$0 sm:$0xff]  ;;  %v3954_v30 = vld [vmem:[%s5436_s3 + $0xf] ss:$0 sm:$0xff] }
  0x6d   :  { %4416 = vmatprep.mubr.msk.f32.mxu0 %vm4633_vm1, %v4632_v2  ;;  %4427 = vmatprep.mubr.msk.f32.mxu1 %vm4633_vm1, %v4632_v2 }
  0x6e   :  { %4430 = vmatprep.subr.mxu0 %v4632_v2  ;;  %4441 = vmatprep.subr.mxu1 %v4632_v2 }
  0x6f   :  { %4417 = vmatmul.mubr.msk.f32.vlgmr.msra.gmra.mxu0 %vm294_vm0, %v29_v31  ;;  %4428 = vmatmul.mubr.msk.f32.vlgmr.msra.gmra.mxu1 %vm294_vm0, %v29_v31 }
  0x70   :  { %4431 = vmatpush3.msra.mxu0 %v121_v32  ;;  %4442 = vmatpush3.msra.mxu1 %v125_v33  ;;  %v3945_v33 = vld [vmem:[%s5436_s3 + $0x6] ss:$0 sm:$0xff] }
  0x71   :  { %4432 = vmatprep.subr.mxu0 %v4632_v2  ;;  %4443 = vmatprep.subr.mxu1 %v4632_v2 }
  0x72   :  { %4433 = vmatpush3.msra.mxu0 %v120_v34  ;;  %4444 = vmatpush3.msra.mxu1 %v124_v35  ;;  %v3946_v34 = vld [vmem:[%s5436_s3 + $0x7] ss:$0 sm:$0xff] }
  0x73   :  { %4434 = vmatprep.subr.mxu0 %v4632_v2  ;;  %4445 = vmatprep.subr.mxu1 %v4632_v2 }
  0x74   :  { %4435 = vmatpush3.msra.mxu0 %v119_v36  ;;  %4446 = vmatpush3.msra.mxu1 %v123_v37 }
  0x75   :  { %4436 = vmatprep.subr.mxu0 %v4632_v2  ;;  %4447 = vmatprep.subr.mxu1 %v4632_v2 }
  0x76   :  { %4437 = vmatpush3.msra.mxu0 %v118_v38  ;;  %4438 = vmatprep.mubr.msk.f32.mxu0 %vm4633_vm1, %v4632_v2 }
  0x77   :  { %4448 = vmatpush3.msra.mxu1 %v122_v39  ;;  %4449 = vmatprep.mubr.msk.f32.mxu1 %vm4633_vm1, %v4632_v2 }
  0x78   :  { %4439 = vmatmul.mubr.msk.f32.vlgmr.msra.gmra.mxu0 %vm294_vm0, %v29_v31  ;;  %4450 = vmatmul.mubr.msk.f32.vlgmr.msra.gmra.mxu1 %vm294_vm0, %v29_v31 }
  0x79   :  { %4452 = vmatprep.subr.mxu0 %v4632_v2  ;;  %4457 = vmatprep.subr.mxu1 %v4632_v2 }
  0x7a   :  { %4454 = vmatprep.mubr.msk.f32.mxu0 %vm4633_vm1, %v4632_v2  ;;  %4459 = vmatprep.mubr.msk.f32.mxu1 %vm4633_vm1, %v4632_v2 }
  0xc9   :  { %v364_v40 = vpop.f32.mrf.mxu0 }
  0xca   :  { %v365_v3 = vadd.f32 %v3939_v60, %v364_v40 }
  0xcb   :  { %v434_v41 = vpop.f32.mrf.mxu1  ;;  %v4198_v42 = vpop.f32.mrf.mxu0 }
  0xcc   :  { %v435_v4 = vadd.f32 %v3940_v61, %v434_v41  ;;  %v3955_v41 = vld [vmem:[%s5436_s3 + $0x10] ss:$0 sm:$0xff]  ;;  %v3956_v42 = vld [vmem:[%s5436_s3 + $0x11] ss:$0 sm:$0xff]  ;;  %v2616_v61 = vlaneseq }
  0xcd   :  { %v4209_v43 = vpop.f32.mrf.mxu1 }
  0xd3   :  { %v504_v44 = vpop.f32.mrf.mxu0 }
  0xd4   :  { %v505_v15 = vadd.f32 %v3941_v9, %v504_v44 }
  0xd5   :  { %v574_v45 = vpop.f32.mrf.mxu1  ;;  %v4220_v46 = vpop.f32.mrf.mxu0 }
  0xd6   :  { %v575_v16 = vadd.f32 %v3942_v10, %v574_v45 }
  0xd7   :  { %v4231_v47 = vpop.f32.mrf.mxu1 }
  0xdd   :  { %v647_v48 = vpop.f32.mrf.mxu0 }
  0xde   :  { %v648_v27 = vadd.f32 %v3943_v21, %v647_v48 }
  0xdf   :  { %v717_v49 = vpop.f32.mrf.mxu1  ;;  %v4242_v50 = vpop.f32.mrf.mxu0 }
  0xe0   :  { %v718_v28 = vadd.f32 %v3944_v22, %v717_v49 }
  0xe1   :  { %v4253_v51 = vpop.f32.mrf.mxu1 }
  0xe7   :  { %v5153_v52 = vpop.f32.mrf.mxu0 }
  0xe8   :  { %v788_v39 = vadd.f32 %v3945_v33, %v5153_v52 }
  0xe9   :  { %v5155_v53 = vpop.f32.mrf.mxu1  ;;  %v4264_v54 = vpop.f32.mrf.mxu0 }
  0xea   :  { %v858_v40 = vadd.f32 %v3946_v34, %v5155_v53 }
  0xeb   :  { %v4275_v55 = vpop.f32.mrf.mxu1 }
  0xf2   :  { %v930_v58 = vpop.f32.mrf.mxu0  ;;  %v1000_v59 = vpop.f32.mrf.mxu1 }
  0xf3   :  { %v931_v62 = vadd.f32 %v3947_v56, %v930_v58  ;;  %v1001_v63 = vadd.f32 %v3948_v57, %v1000_v59 }
  0xf4   :  { %v4286_v0 = vpop.f32.mrf.mxu0  ;;  %v4297_v1 = vpop.f32.mrf.mxu1 }
  0xf5   :  { %4453 = vmatpush3.xpose.msk.msra.mxu0 %vm1993_vm2, %v931_v62  ;;  %4458 = vmatpush3.xpose.msk.msra.mxu1 %vm1993_vm2, %v1001_v63  ;;  %v2610_v62 = vld [vmem:[%s5434_s1] sm:$0x1]  ;;  %v2617_v63 = vshrl.u32 %v2616_v61, 7  ;;  %v4634_v1 = vmov 0  }
  0xf6   :  { %4462 = vmatprep.subr.mxu0 %v4632_v2  ;;  %4467 = vmatprep.subr.mxu1 %v4632_v2  ;;  %vm2612_vm3 = vcmp.eq.f32.partialorder %v2610_v62, 0.0 }
  0xf7   :  { %v2618_v0 = vsub.s32 0, %v2617_v63 }
  0xf8   :  { %4455 = vmatmul.mubr.msk.f32.vlgmr.msra.gmra.mxu0 %vm1993_vm2, %v365_v3  ;;  %4460 = vmatmul.mubr.msk.f32.vlgmr.msra.gmra.mxu1 %vm1993_vm2, %v435_v4  ;;  %v2614_v3 = vsel %vm2612_vm3, 1, %v4634_v1 }
  0xf9   :  { %4464 = vmatprep.mubr.msk.f32.mxu0 %vm4633_vm1, %v4632_v2  ;;  %4469 = vmatprep.mubr.msk.f32.mxu1 %vm4633_vm1, %v4632_v2  ;;  %v2619_v4 = vrot.slane %v2614_v3, %v2618_v0 }
  0xfb   :  { %vm2624_vm4 = vcmp.eq.s32.totalorder %v2619_v4, 1 }
  0xfc   :  { %v1070_v7 = vpop.f32.mrf.mxu0  ;;  %v1140_v8 = vpop.f32.mrf.mxu1 }
  0xfd   :  { %v1071_v11 = vadd.f32 %v3949_v5, %v1070_v7  ;;  %v1141_v12 = vadd.f32 %v3950_v6, %v1140_v8 }
  0xfe   :  { %v4308_v13 = vpop.f32.mrf.mxu0  ;;  %v4319_v14 = vpop.f32.mrf.mxu1 }
  0xff   :  { %4463 = vmatpush3.xpose.msk.msra.mxu0 %vm1993_vm2, %v1071_v11  ;;  %4468 = vmatpush3.xpose.msk.msra.mxu1 %vm1993_vm2, %v1141_v12  ;;  %v2611_v14 = vld [vmem:[%s5434_s1 + $0x1] sm:$0x1] }
 0x100   :  { %4472 = vmatprep.subr.mxu0 %v4632_v2  ;;  %4477 = vmatprep.subr.mxu1 %v4632_v2  ;;  %vm2613_vm5 = vcmp.eq.f32.partialorder %v2611_v14, 0.0 }
 0x102   :  { %4465 = vmatmul.mubr.msk.f32.vlgmr.msra.gmra.mxu0 %vm1993_vm2, %v505_v15  ;;  %4470 = vmatmul.mubr.msk.f32.vlgmr.msra.gmra.mxu1 %vm1993_vm2, %v575_v16 }
 0x103   :  { %4474 = vmatprep.mubr.msk.f32.mxu0 %vm4633_vm1, %v4632_v2  ;;  %4479 = vmatprep.mubr.msk.f32.mxu1 %vm4633_vm1, %v4632_v2 }
 0x106   :  { %v1213_v19 = vpop.f32.mrf.mxu0  ;;  %v1283_v20 = vpop.f32.mrf.mxu1 }
 0x107   :  { %v1214_v23 = vadd.f32 %v3951_v17, %v1213_v19  ;;  %v1284_v24 = vadd.f32 %v3952_v18, %v1283_v20 }
 0x108   :  { %v4330_v25 = vpop.f32.mrf.mxu0  ;;  %v4341_v26 = vpop.f32.mrf.mxu1 }
 0x109   :  { %4473 = vmatpush3.xpose.msk.msra.mxu0 %vm1993_vm2, %v1214_v23  ;;  %4478 = vmatpush3.xpose.msk.msra.mxu1 %vm1993_vm2, %v1284_v24  ;;  %v2615_v23 = vsel %vm2613_vm5, 1, %v4634_v1 }
 0x10a   :  { %4482 = vmatprep.subr.mxu0 %v4632_v2  ;;  %4487 = vmatprep.subr.mxu1 %v4632_v2  ;;  %v2623_v26 = vrot.slane %v2615_v23, %v2618_v0 }
 0x10c   :  { %4475 = vmatmul.mubr.msk.f32.vlgmr.msra.gmra.mxu0 %vm1993_vm2, %v648_v27  ;;  %4480 = vmatmul.mubr.msk.f32.vlgmr.msra.gmra.mxu1 %vm1993_vm2, %v718_v28  ;;  %vm2625_vm6 = vcmp.eq.s32.totalorder %v2623_v26, 1 }
 0x10d   :  { %4484 = vmatprep.mubr.msk.f32.mxu0 %vm4633_vm1, %v4632_v2  ;;  %4489 = vmatprep.mubr.msk.f32.mxu1 %vm4633_vm1, %v4632_v2 }
 0x110   :  { %v1353_v31 = vpop.f32.mrf.mxu0  ;;  %v1423_v32 = vpop.f32.mrf.mxu1 }
 0x111   :  { %v1354_v35 = vadd.f32 %v3953_v29, %v1353_v31  ;;  %v1424_v36 = vadd.f32 %v3954_v30, %v1423_v32 }
 0x112   :  { %v4352_v37 = vpop.f32.mrf.mxu0  ;;  %v4363_v38 = vpop.f32.mrf.mxu1 }
 0x113   :  { %4483 = vmatpush3.xpose.msk.msra.mxu0 %vm1993_vm2, %v1354_v35  ;;  %4488 = vmatpush3.xpose.msk.msra.mxu1 %vm1993_vm2, %v1424_v36 }
 0x114   :  { %4492 = vmatprep.subr.mxu0 %v4632_v2  ;;  %4497 = vmatprep.subr.mxu1 %v4632_v2 }
 0x116   :  { %4485 = vmatmul.mubr.msk.f32.vlgmr.msra.gmra.mxu0 %vm1993_vm2, %v788_v39  ;;  %4490 = vmatmul.mubr.msk.f32.vlgmr.msra.gmra.mxu1 %vm1993_vm2, %v858_v40 }
 0x117   :  { %4494 = vmatprep.mubr.msk.f32.mxu0 %vm4633_vm1, %v4632_v2  ;;  %4499 = vmatprep.mubr.msk.f32.mxu1 %vm4633_vm1, %v4632_v2 }
 0x11b   :  { %v1496_v43 = vpop.f32.mrf.mxu0  ;;  %v1566_v44 = vpop.f32.mrf.mxu1 }
 0x11c   :  { %v1497_v45 = vadd.f32 %v3955_v41, %v1496_v43  ;;  %v1567_v46 = vadd.f32 %v3956_v42, %v1566_v44 }
 0x11d   :  { %v4374_v47 = vpop.f32.mrf.mxu0  ;;  %v4385_v48 = vpop.f32.mrf.mxu1 }
 0x11e   :  { %4493 = vmatpush3.msra.mxu0 %v1497_v45  ;;  %4498 = vmatpush3.msra.mxu1 %v1567_v46 }
 0x11f   :  { %4502 = vmatprep.subr.mxu0 %v4632_v2  ;;  %4507 = vmatprep.subr.mxu1 %v4632_v2 }
 0x125   :  { %v5255_v49 = vpop.f32.mrf.mxu0  ;;  %v5257_v50 = vpop.f32.mrf.mxu1 }
 0x127   :  { %v4396_v51 = vpop.f32.mrf.mxu0  ;;  %v4407_v52 = vpop.f32.mrf.mxu1 }
 0x12f   :  { %v5259_v53 = vpop.f32.mrf.mxu0  ;;  %v5261_v54 = vpop.f32.mrf.mxu1 }
 0x131   :  { %v4418_v55 = vpop.f32.mrf.mxu0  ;;  %v4429_v56 = vpop.f32.mrf.mxu1 }
 0x138   :  { %v5263_v57 = vpop.f32.mrf.mxu0  ;;  %v5265_v58 = vpop.f32.mrf.mxu1 }
 0x13a   :  { %v4440_v59 = vpop.f32.mrf.mxu0  ;;  %v4451_v60 = vpop.f32.mrf.mxu1 }
 0x1b8   :  { %v2066_v5 = vpop.f32.mrf.mxu0  ;;  %v2142_v6 = vpop.f32.mrf.mxu1 }
 0x1b9   :  { %v2602_v7 = vmul.f32 0.35355338, %v2066_v5  ;;  %v2603_v8 = vmul.f32 0.35355338, %v2142_v6 }
 0x1ba   :  { %v4456_v9 = vpop.f32.mrf.mxu0  ;;  %v4461_v10 = vpop.f32.mrf.mxu1 }
 0x1bb   :  { %v2626_v11 = vsel %vm2624_vm4, -60000.0, %v2602_v7  ;;  %v2627_v13 = vsel %vm2624_vm4, -60000.0, %v2603_v8 }
 0x1bc   :  { %v2634_v12 = vsel %vm1993_vm2, %v2626_v11, -inf  ;;  %v2637_v15 = vsel %vm1993_vm2, %v2627_v13, -inf }
 0x1bd   :  { %2635 = vmax.xlane.f32.xlu0 %v2634_v12 }
 0x1c1   :  { %2638 = vmax.xlane.f32.xlu0 %v2637_v15 }
 0x1c2   :  { %v2218_v16 = vpop.f32.mrf.mxu0  ;;  %v2294_v17 = vpop.f32.mrf.mxu1 }
 0x1c3   :  { %v2604_v18 = vmul.f32 0.35355338, %v2218_v16  ;;  %v2605_v19 = vmul.f32 0.35355338, %v2294_v17 }
 0x1c4   :  { %v4466_v20 = vpop.f32.mrf.mxu0  ;;  %v4471_v21 = vpop.f32.mrf.mxu1 }
 0x1c5   :  { %v2628_v22 = vsel %vm2624_vm4, -60000.0, %v2604_v18  ;;  %v2629_v25 = vsel %vm2624_vm4, -60000.0, %v2605_v19 }
 0x1c6   :  { %v2640_v24 = vsel %vm1993_vm2, %v2628_v22, -inf  ;;  %v2643_v27 = vsel %vm1993_vm2, %v2629_v25, -inf }
 0x1c7   :  { %2641 = vmax.xlane.f32.xlu1 %v2640_v24 }
 0x1cb   :  { %2644 = vmax.xlane.f32.xlu1 %v2643_v27 }
 0x1cc   :  { %v2370_v28 = vpop.f32.mrf.mxu0  ;;  %v2446_v29 = vpop.f32.mrf.mxu1 }
 0x1cd   :  { %v2606_v30 = vmul.f32 0.35355338, %v2370_v28  ;;  %v2607_v31 = vmul.f32 0.35355338, %v2446_v29 }
 0x1ce   :  { %v4476_v32 = vpop.f32.mrf.mxu0  ;;  %v4481_v33 = vpop.f32.mrf.mxu1 }
 0x1cf   :  { %v2631_v34 = vsel %vm2625_vm6, -60000.0, %v2607_v31  ;;  %v2630_v35 = vsel %vm2625_vm6, -60000.0, %v2606_v30 }
 0x1d0   :  { %v2649_v36 = vsel %vm1993_vm2, %v2631_v34, -inf  ;;  %v2646_v37 = vsel %vm1993_vm2, %v2630_v35, -inf }
 0x1d1   :  { %2650 = vmax.xlane.f32.xlu1 %v2649_v36  ;;  %2647 = vmax.xlane.f32.xlu0 %v2646_v37 }
 0x1d6   :  { %v2522_v38 = vpop.f32.mrf.mxu0  ;;  %v2598_v39 = vpop.f32.mrf.mxu1 }
 0x1d7   :  { %v2608_v40 = vmul.f32 0.35355338, %v2522_v38  ;;  %v2609_v41 = vmul.f32 0.35355338, %v2598_v39  ;;  %v3958_v39 = vld [vmem:[%s5436_s3 + $0x13] ss:$0 sm:$0xff] }
 0x1d8   :  { %v4486_v42 = vpop.f32.mrf.mxu0  ;;  %v4491_v43 = vpop.f32.mrf.mxu1 }
 0x1d9   :  { %v2633_v44 = vsel %vm2625_vm6, -60000.0, %v2609_v41  ;;  %v2632_v45 = vsel %vm2625_vm6, -60000.0, %v2608_v40  ;;  %v1707_v42 = vadd.f32 %v3958_v39, %v5257_v50 }
 0x1da   :  { %v2655_v46 = vsel %vm1993_vm2, %v2633_v44, -inf  ;;  %v2652_v47 = vsel %vm1993_vm2, %v2632_v45, -inf }
 0x1db   :  { %2656 = vmax.xlane.f32.xlu1 %v2655_v46  ;;  %2653 = vmax.xlane.f32.xlu0 %v2652_v47  ;;  %v3960_v47 = vld [vmem:[%s5436_s3 + $0x15] ss:$0 sm:$0xff] }
 0x246   :  { %v2636_v48 = vpop.xlane.xlu0 %2635 }
 0x247   :  { %v2658_v51 = vsub.f32 %v2626_v11, %v2636_v48 }
 0x249   :  { %v2666_v52 = vmul.f32 1.442695, %v2658_v51 }
 0x24a   :  { %v2639_v55 = vpop.xlane.xlu0 %2638 }
 0x24b   :  { %4578 = vpow2.f32 %v2666_v52  ;;  %v2659_v56 = vsub.f32 %v2627_v13, %v2639_v55  ;;  %v1850_v52 = vadd.f32 %v3960_v47, %v5261_v54  ;;  %v3961_v54 = vld [vmem:[%s5436_s3 + $0x16] ss:$0 sm:$0xff] }
 0x24d   :  { %v2668_v59 = vmul.f32 1.442695, %v2659_v56 }
 0x24f   :  { %4580 = vpow2.f32 %v2668_v59 }
 0x250   :  { %v2642_v60 = vpop.xlane.xlu1 %2641 }
 0x251   :  { %v2660_v61 = vsub.f32 %v2628_v22, %v2642_v60 }
 0x253   :  { %v2670_v62 = vmul.f32 1.442695, %v2660_v61 }
 0x254   :  { %v2645_v63 = vpop.xlane.xlu1 %2644 }
 0x255   :  { %4582 = vpow2.f32 %v2670_v62  ;;  %v2661_v0 = vsub.f32 %v2629_v25, %v2645_v63 }
 0x257   :  { %v2672_v1 = vmul.f32 1.442695, %v2661_v0  ;;  %v1920_v0 = vadd.f32 %v3961_v54, %v5263_v57 }
 0x258   :  { %v4579_v3 = vpop.eup %4578 }
 0x259   :  { %4584 = vpow2.f32 %v2672_v1  ;;  %v2682_v4 = vsel %vm1993_vm2, %v4579_v3, 0.0 }
 0x25a   :  { %v2651_v5 = vpop.xlane.xlu1 %2650  ;;  %v2648_v6 = vpop.xlane.xlu0 %2647  ;;  %2683 = vadd.xlane.f32.xlu0 %v2682_v4  ;;  %v3306_v4 = vld [vmem:[%s5437_s4] sm:$0xff] }
 0x25b   :  { %v2663_v7 = vsub.f32 %v2631_v34, %v2651_v5  ;;  %v2662_v8 = vsub.f32 %v2630_v35, %v2648_v6  ;;  %v3957_v34 = vld [vmem:[%s5436_s3 + $0x12] ss:$0 sm:$0xff]  ;;  %v3307_v5 = vld [vmem:[%s5437_s4 + $0x8] sm:$0xff] }
 0x25c   :  { %v4581_v9 = vpop.eup %4580  ;;  %v1637_v38 = vadd.f32 %v3957_v34, %v5255_v49  ;;  %v3959_v49 = vld [vmem:[%s5436_s3 + $0x14] ss:$0 sm:$0xff] }
 0x25d   :  { %v2676_v10 = vmul.f32 1.442695, %v2663_v7  ;;  %v2674_v11 = vmul.f32 1.442695, %v2662_v8  ;;  %v2685_v12 = vsel %vm1993_vm2, %v4581_v9, 0.0  ;;  %v1780_v50 = vadd.f32 %v3959_v49, %v5259_v53  ;;  %v3308_v6 = vld [vmem:[%s5437_s4 + $0x10] sm:$0xff] }
 0x25e   :  { %2686 = vadd.xlane.f32.xlu1 %v2685_v12  ;;  %v3962_v53 = vld [vmem:[%s5436_s3 + $0x17] ss:$0 sm:$0xff]  ;;  %v3310_v12 = vld [vmem:[%s5437_s4 + $0x20] sm:$0xff] }
 0x25f   :  { %4586 = vpow2.f32 %v2676_v10  ;;  %v1990_v62 = vadd.f32 %v3962_v53, %v5265_v58 }
 0x260   :  { %4588 = vpow2.f32 %v2674_v11 }
 0x262   :  { %v4583_v13 = vpop.eup %4582 }
 0x263   :  { %v2688_v14 = vsel %vm1993_vm2, %v4583_v13, 0.0 }
 0x264   :  { %v2657_v15 = vpop.xlane.xlu1 %2656  ;;  %v2654_v16 = vpop.xlane.xlu0 %2653  ;;  %2689 = vadd.xlane.f32.xlu0 %v2688_v14 }
 0x265   :  { %v2665_v17 = vsub.f32 %v2633_v44, %v2657_v15  ;;  %v2664_v18 = vsub.f32 %v2632_v45, %v2654_v16  ;;  %v3311_v15 = vld [vmem:[%s5437_s4 + $0x28] sm:$0xff] }
 0x266   :  { %v4585_v19 = vpop.eup %4584 }
 0x267   :  { %v2680_v20 = vmul.f32 1.442695, %v2665_v17  ;;  %v2678_v21 = vmul.f32 1.442695, %v2664_v18  ;;  %v2691_v22 = vsel %vm1993_vm2, %v4585_v19, 0.0  ;;  %v3313_v18 = vld [vmem:[%s5437_s4 + $0x38] sm:$0xff] }
 0x268   :  { %2692 = vadd.xlane.f32.xlu1 %v2691_v22 }
 0x269   :  { %4590 = vpow2.f32 %v2680_v20  ;;  %v3312_v20 = vld [vmem:[%s5437_s4 + $0x30] sm:$0xff] }
 0x26a   :  { %4592 = vpow2.f32 %v2678_v21 }
 0x26c   :  { %v5293_v23 = vpop.eup %4586 }
 0x26d   :  { %v5295_v24 = vpop.eup %4588  ;;  %v2697_v25 = vsel %vm1993_vm2, %v5293_v23, 0.0 }
 0x26e   :  { %2698 = vadd.xlane.f32.xlu1 %v2697_v25  ;;  %v2694_v26 = vsel %vm1993_vm2, %v5295_v24, 0.0 }
 0x26f   :  { %2695 = vadd.xlane.f32.xlu0 %v2694_v26 }
 0x276   :  { %v5301_v27 = vpop.eup %4590 }
 0x277   :  { %v5303_v28 = vpop.eup %4592  ;;  %v2703_v29 = vsel %vm1993_vm2, %v5301_v27, 0.0 }
 0x278   :  { %2704 = vadd.xlane.f32.xlu1 %v2703_v29  ;;  %v2700_v30 = vsel %vm1993_vm2, %v5303_v28, 0.0 }
 0x279   :  { %2701 = vadd.xlane.f32.xlu0 %v2700_v30 }
 0x2e3   :  { %v2684_v31 = vpop.xlane.xlu0 %2683 }
 0x2e4   :  { %4594 = vrcp.f32 %v2684_v31 }
 0x2e7   :  { %v2687_v32 = vpop.xlane.xlu1 %2686 }
 0x2e8   :  { %4596 = vrcp.f32 %v2687_v32 }
 0x2ed   :  { %v2690_v33 = vpop.xlane.xlu0 %2689 }
 0x2ee   :  { %4598 = vrcp.f32 %v2690_v33 }
 0x2f1   :  { %v4595_v35 = vpop.eup %4594  ;;  %v2693_v36 = vpop.xlane.xlu1 %2692 }
 0x2f2   :  { %4600 = vrcp.f32 %v2693_v36  ;;  %v2714_v37 = vmul.f32 %v4595_v35, %v4579_v3 }
 0x2f4   :  { %4495 = vmatmul.mubr.msk.f32.vlgmr.msra.gmra.mxu0 %vm1993_vm2, %v2714_v37 }
 0x2f5   :  { %v4597_v40 = vpop.eup %4596  ;;  %4503 = vmatpush3.msra.mxu0 %v1637_v38  ;;  %4504 = vmatprep.mubr.msk.f32.mxu0 %vm4633_vm1, %v4632_v2 }
 0x2f6   :  { %v2715_v41 = vmul.f32 %v4597_v40, %v4581_v9  ;;  %4512 = vmatprep.subr.mxu0 %v4632_v2  ;;  %v3309_v9 = vld [vmem:[%s5437_s4 + $0x18] sm:$0xff]  ;;  %v4019_v40 = vld [vmem:[%s5438_s5] ss:$0 sm:$0xff]  ;;  %s4635_s5 = smov [#allocation2]  }
 0x2f7   :  { %v2699_v43 = vpop.xlane.xlu1 %2698  ;;  %s3928_s0 = sshll.u32 %s4635_s5, 4  ;;  %s3929_s0 = int_to_ptr.vmem [resolvable:$true] %s3928_s0 }
 0x2f8   :  { %4602 = vrcp.f32 %v2699_v43  ;;  %v2696_v44 = vpop.xlane.xlu0 %2695  ;;  %4500 = vmatmul.mubr.msk.f32.vlgmr.msra.gmra.mxu1 %vm1993_vm2, %v2715_v41  ;;  %s4610_s21 = scalar_lea.vmem %s3929_s0, 256  ;;  %p4615_p1 = scmp.lt.s32.totalorder %s3929_s0, %s3929_s0 }
 0x2f9   :  { %4604 = vrcp.f32 %v2696_v44  ;;  %4508 = vmatpush3.msra.mxu1 %v1707_v42  ;;  %4509 = vmatprep.mubr.msk.f32.mxu1 %vm4633_vm1, %v4632_v2  ;;  %p4611_p0 = scmp.ne.s32.totalorder %s3929_s0, %s4610_s21  ;;  %p4616_p2 = scmp.lt.s32.totalorder %s4610_s21, %s4610_s21 }
 0x2fa   :  { %4517 = vmatprep.subr.mxu1 %v4632_v2 }
 0x2fb   :  { %v4599_v45 = vpop.eup %4598  ;;  %p4617_p3 = por %p4616_p2, %p4615_p1 }
 0x2fc   :  { %v2716_v46 = vmul.f32 %v4599_v45, %v4583_v13 }
 0x2fd   :  { %p4618_p4 = pnand %p4617_p3, %p4611_p0 }
 0x2fe   :  { %4505 = vmatmul.mubr.msk.f32.vlgmr.msra.gmra.mxu0 %vm1993_vm2, %v2716_v46 }
 0x2ff   :  { %v4601_v48 = vpop.eup %4600  ;;  %4513 = vmatpush3.msra.mxu0 %v1780_v50  ;;  %4514 = vmatprep.mubr.msk.f32.mxu0 %vm4633_vm1, %v4632_v2 }
 0x300   :  { %v2717_v51 = vmul.f32 %v4601_v48, %v4585_v19  ;;  %4522 = vmatprep.subr.mxu0 %v4632_v2 }
 0x301   :  { %v2705_v55 = vpop.xlane.xlu1 %2704 }
 0x302   :  { %4606 = vrcp.f32 %v2705_v55  ;;  %v2702_v56 = vpop.xlane.xlu0 %2701  ;;  %4510 = vmatmul.mubr.msk.f32.vlgmr.msra.gmra.mxu1 %vm1993_vm2, %v2717_v51 }
 0x303   :  { %4608 = vrcp.f32 %v2702_v56  ;;  %4518 = vmatpush3.msra.mxu1 %v1850_v52  ;;  %4519 = vmatprep.mubr.msk.f32.mxu1 %vm4633_vm1, %v4632_v2 }
 0x304   :  { %4527 = vmatprep.subr.mxu1 %v4632_v2 }
 0x305   :  { %v4603_v59 = vpop.eup %4602 }
 0x306   :  { %v4605_v60 = vpop.eup %4604  ;;  %v2719_v61 = vmul.f32 %v4603_v59, %v5293_v23 }
 0x307   :  { %v2718_v63 = vmul.f32 %v4605_v60, %v5295_v24 }
 0x308   :  { %4520 = vmatmul.mubr.msk.f32.vlgmr.msra.gmra.mxu1 %vm1993_vm2, %v2719_v61 }
 0x309   :  { %4515 = vmatmul.mubr.msk.f32.vlgmr.msra.gmra.mxu0 %vm1993_vm2, %v2718_v63  ;;  %4528 = vmatpush3.msra.mxu1 %v1990_v62 }
 0x30a   :  { %4523 = vmatpush3.msra.mxu0 %v1920_v0  ;;  %4524 = vmatprep.mubr.msk.f32.mxu0 %vm4633_vm1, %v4632_v2 }
 0x30b   :  { %4529 = vmatprep.mubr.msk.f32.mxu1 %vm4633_vm1, %v4632_v2  ;;  %4532 = vmatprep.subr.mxu0 %v4632_v2 }
 0x30c   :  { %4537 = vmatprep.subr.mxu1 %v4632_v2 }
 0x30f   :  { %v4607_v58 = vpop.eup %4606 }
 0x310   :  { %v4609_v1 = vpop.eup %4608  ;;  %v2721_v57 = vmul.f32 %v4607_v58, %v5301_v27 }
 0x311   :  { %v2720_v3 = vmul.f32 %v4609_v1, %v5303_v28 }
 0x312   :  { %4530 = vmatmul.mubr.msk.f32.vlgmr.msra.gmra.mxu1 %vm1993_vm2, %v2721_v57 }
 0x313   :  { %4525 = vmatmul.mubr.msk.f32.vlgmr.msra.gmra.mxu0 %vm1993_vm2, %v2720_v3  ;;  %4539 = vmatprep.mubr.msk.f32.mxu1 %vm4633_vm1, %v4632_v2 }
 0x314   :  { %4534 = vmatprep.mubr.msk.f32.mxu0 %vm4633_vm1, %v4632_v2  ;;  %4533 = vmatpush3.msra.mxu0 %v3306_v4 }
 0x315   :  { %4542 = vmatprep.subr.mxu0 %v4632_v2  ;;  %4538 = vmatpush3.msra.mxu1 %v3307_v5 }
 0x316   :  { %4547 = vmatprep.subr.mxu1 %v4632_v2 }
 0x3b4   :  { %v2791_v7 = vpop.f32.mrf.mxu0 }
 0x3b5   :  { %4535 = vmatmul.mubr.msk.f32.vlgmr.msra.gmra.mxu0 %vm1993_vm2, %v2791_v7 }
 0x3b6   :  { %v4496_v8 = vpop.f32.mrf.mxu0  ;;  %4543 = vmatpush3.msra.mxu0 %v3308_v6  ;;  %4544 = vmatprep.mubr.msk.f32.mxu0 %vm4633_vm1, %v4632_v2 }
 0x3b7   :  { %4552 = vmatprep.subr.mxu0 %v4632_v2 }
 0x3b8   :  { %v2864_v10 = vpop.f32.mrf.mxu1 }
 0x3b9   :  { %4540 = vmatmul.mubr.msk.f32.vlgmr.msra.gmra.mxu1 %vm1993_vm2, %v2864_v10 }
 0x3ba   :  { %v4501_v11 = vpop.f32.mrf.mxu1  ;;  %4548 = vmatpush3.msra.mxu1 %v3309_v9  ;;  %4549 = vmatprep.mubr.msk.f32.mxu1 %vm4633_vm1, %v4632_v2 }
 0x3bb   :  { %4557 = vmatprep.subr.mxu1 %v4632_v2 }
 0x3be   :  { %v2937_v13 = vpop.f32.mrf.mxu0 }
 0x3bf   :  { %4545 = vmatmul.mubr.msk.f32.vlgmr.msra.gmra.mxu0 %vm1993_vm2, %v2937_v13 }
 0x3c0   :  { %v4506_v14 = vpop.f32.mrf.mxu0  ;;  %4553 = vmatpush3.msra.mxu0 %v3310_v12  ;;  %4554 = vmatprep.mubr.msk.f32.mxu0 %vm4633_vm1, %v4632_v2 }
 0x3c1   :  { %4562 = vmatprep.subr.mxu0 %v4632_v2 }
 0x3c2   :  { %v3010_v16 = vpop.f32.mrf.mxu1 }
 0x3c3   :  { %4550 = vmatmul.mubr.msk.f32.vlgmr.msra.gmra.mxu1 %vm1993_vm2, %v3010_v16 }
 0x3c4   :  { %v4511_v17 = vpop.f32.mrf.mxu1  ;;  %4558 = vmatpush3.msra.mxu1 %v3311_v15  ;;  %4559 = vmatprep.mubr.msk.f32.mxu1 %vm4633_vm1, %v4632_v2 }
 0x3c5   :  { %4567 = vmatprep.subr.mxu1 %v4632_v2 }
 0x3c8   :  { %v3156_v19 = vpop.f32.mrf.mxu1 }
 0x3c9   :  { %v3083_v21 = vpop.f32.mrf.mxu0  ;;  %4560 = vmatmul.mubr.msk.f32.vlgmr.msra.gmra.mxu1 %vm1993_vm2, %v3156_v19 }
 0x3ca   :  { %4555 = vmatmul.mubr.msk.f32.vlgmr.msra.gmra.mxu0 %vm1993_vm2, %v3083_v21  ;;  %v4521_v22 = vpop.f32.mrf.mxu1  ;;  %4568 = vmatpush3.msra.mxu1 %v3313_v18 }
 0x3cb   :  { %v4516_v23 = vpop.f32.mrf.mxu0  ;;  %4563 = vmatpush3.msra.mxu0 %v3312_v20  ;;  %4564 = vmatprep.mubr.msk.f32.mxu0 %vm4633_vm1, %v4632_v2 }
 0x3cc   :  { %4569 = vmatprep.mubr.msk.f32.mxu1 %vm4633_vm1, %v4632_v2 }
 0x3d2   :  { %v3302_v24 = vpop.f32.mrf.mxu1 }
 0x3d3   :  { %v3229_v25 = vpop.f32.mrf.mxu0  ;;  %4570 = vmatmul.mubr.msk.f32.vlgmr.msra.gmra.mxu1 %vm1993_vm2, %v3302_v24 }
 0x3d4   :  { %4565 = vmatmul.mubr.msk.f32.vlgmr.msra.gmra.mxu0 %vm1993_vm2, %v3229_v25  ;;  %v4531_v26 = vpop.f32.mrf.mxu1 }
 0x3d5   :  { %v4526_v27 = vpop.f32.mrf.mxu0 }
 0x475   :  { %v3383_v28 = vpop.f32.mrf.mxu0 }
 0x476   :  { %v3898_v34 = vsel %vm294_vm0, %v3383_v28, 0.0 }
 0x477   :  { %v4536_v29 = vpop.f32.mrf.mxu0 }
 0x479   :  { %v3456_v30 = vpop.f32.mrf.mxu1 }
 0x47a   :  { %v3899_v32 = vsel %vm294_vm0, %v3456_v30, 0.0 }
 0x47b   :  { %v4541_v31 = vpop.f32.mrf.mxu1  ;;  %v3900_v2 = vadd.f32 %v3899_v32, %v3898_v34 }
 0x47f   :  { %v3529_v33 = vpop.f32.mrf.mxu0 }
 0x480   :  { %v3901_v35 = vsel %vm294_vm0, %v3529_v33, 0.0 }
 0x481   :  { %v4546_v36 = vpop.f32.mrf.mxu0  ;;  %v3902_v37 = vadd.f32 %v3901_v35, %v3900_v2 }
 0x483   :  { %v3602_v38 = vpop.f32.mrf.mxu1 }
 0x484   :  { %v3903_v39 = vsel %vm294_vm0, %v3602_v38, 0.0 }
 0x485   :  { %v3904_v41 = vadd.f32 %v3903_v39, %v3902_v37  ;;  %v4551_v42 = vpop.f32.mrf.mxu1 }
 0x487   :  { %v3919_v43 = vadd.f32 %v4019_v40, %v3904_v41 }
 0x489   :  { %3921 = vst.msk [vmem:[#allocation2] sm:$0xff] %vm294_vm0, %v3919_v43  ;;  %v3748_v44 = vpop.f32.mrf.mxu1 }
 0x48a   :  { %v3675_v49 = vpop.f32.mrf.mxu0  ;;  %v3906_v47 = vsel %vm294_vm0, %v3748_v44, 0.0 }
 0x48b   :  { %v4561_v45 = vpop.f32.mrf.mxu1  ;;  %v3905_v50 = vsel %vm294_vm0, %v3675_v49, 0.0 }
 0x48c   :  { %v4556_v46 = vpop.f32.mrf.mxu0  ;;  %v3907_v51 = vadd.f32 %v3906_v47, %v3905_v50 }
 0x493   :  { %v3894_v48 = vpop.f32.mrf.mxu1 }
 0x494   :  { %v3821_v52 = vpop.f32.mrf.mxu0  ;;  %v3910_v54 = vsel %vm294_vm0, %v3894_v48, 0.0 }
 0x495   :  { %v3908_v55 = vsel %vm294_vm0, %v3821_v52, 0.0  ;;  %v4571_v56 = vpop.f32.mrf.mxu1 }
 0x496   :  { %v3909_v53 = vadd.f32 %v3908_v55, %v3907_v51  ;;  %v4566_v59 = vpop.f32.mrf.mxu0 }
 0x498   :  { %v3911_v60 = vadd.f32 %v3910_v54, %v3909_v53 }
 0x49a   :  { %v3920_v61 = vadd.f32 %v4019_v40, %v3911_v60 }
 0x49c   :  { %3922 = vst.msk [vmem:[#allocation2 + $0x8] sm:$0xff] %vm294_vm0, %v3920_v61 }
 0x49d   :  { %4621 = shalt.err (!%p4618_p4)
}
 0x49e   :  { %s4636_s22 = smov 128   ;;  %s4637_s23 = smov 8  }
 0x49f   :  { %3934 = dma.vmem_to_hbm [thread:$0]  %s3929_s0, 256, %s5439_s6, [#allocation3], %s4636_s22, %s4636_s22, %s4637_s23  }
 0x4a0   :  { %4630 = dma.done.wait [#allocation3], 256  }
 0x4a1   :  { %4631 = vsyncadd [#allocation3], 4294967040 }
 0x4a2   :  { %3938 = vsyncpa [#allocation3], 1 }

</bundles_post_ra>
